<compile_context>
chip_gen: v5e
topology: v5e:2x2
jax: 0.10.0
libtpu: 0.0.40
codegen_flags: <defaults>
</compile_context>

<pallas_src>
import jax
import jax.numpy as jnp
from jax.experimental import pallas as pl
from jax.experimental.pallas import tpu as pltpu


def _scale_kernel(gate_ref, x_ref, o_ref):
    # gate_ref: (1, C, 1) ; x_ref / o_ref: (1, C, hw_tile)
    # Native-dtype multiply, gate broadcast over the lane (spatial) axis.
    o_ref[0] = x_ref[0] * gate_ref[0]


def _pick_hw_tile(C, HW, itemsize, max_tile_bytes=2 * 1024 * 1024):
    """Largest lane-dense tile (multiple of 128) within the per-tile budget."""
    max_lanes = (max_tile_bytes // max(1, C * itemsize)) // 128 * 128
    max_lanes = max(128, max_lanes)
    if HW <= max_lanes:
        return HW            # full spatial extent (block dim == array dim is legal)
    return max_lanes         # multiple of 128; remainder handled by masking / OOB drop


def local_forward(x_nchw, w1, b1, w2, b2):
    """x_nchw: (N, C, H, W); w1: (hidden, C); b1: (hidden,); w2: (C, hidden); b2: (C,)."""
    N, C, H, W = x_nchw.shape
    hidden = w1.shape[0]
    HW = H * W
    dtype = x_nchw.dtype
    itemsize = jnp.dtype(dtype).itemsize

    # Free reshape: channels on sublane, spatial on lane.  No transposes.
    x = x_nchw.reshape(N, C, HW)

    hw_tile = _pick_hw_tile(C, HW, itemsize)
    num_tiles = pl.cdiv(HW, hw_tile)
    need_mask = (HW % hw_tile) != 0

    # Tiny weight reshapes (negligible) so the gate MLP is pure broadcast + reduce.
    w1_t = jnp.transpose(w1).astype(jnp.float32)        # (C, hidden)
    b1_r = b1.reshape(1, hidden).astype(jnp.float32)    # (1, hidden)
    w2_r = w2.astype(jnp.float32)                       # (C, hidden)
    b2_r = b2.reshape(C, 1).astype(jnp.float32)         # (C, 1)

    vmem_limit = 32 * 1024 * 1024  # explicit; fits v5e/v6e/v7x scoped VMEM

    # ---------------- Pass 1: spatial mean + gate MLP (VPU only) -------------
    def pool_gate_kernel(x_ref, w1t_ref, b1_ref, w2_ref, b2_ref, gate_ref, acc_ref):
        t = pl.program_id(1)

        @pl.when(t == 0)
        def _():
            acc_ref[...] = jnp.zeros_like(acc_ref)

        xt = x_ref[0].astype(jnp.float32)                        # (C, hw_tile)
        if need_mask:
            lane = jax.lax.broadcasted_iota(jnp.int32, xt.shape, 1)
            valid = (t * hw_tile + lane) < HW
            xt = jnp.where(valid, xt, 0.0)
        acc_ref[...] += jnp.sum(xt, axis=1, keepdims=True)       # (C, 1)

        @pl.when(t == pl.num_programs(1) - 1)
        def _():
            pooled = acc_ref[...] / jnp.float32(HW)              # (C, 1)
            # Conv1x1_1 + ReLU:   h[o] = relu(sum_c w1[o,c]*pooled[c] + b1[o])
            h = jnp.sum(w1t_ref[...] * pooled, axis=0, keepdims=True) + b1_ref[...]
            h = jnp.maximum(h, 0.0)                              # (1, hidden)
            # Conv1x1_2 + Sigmoid: y[c] = sigmoid(sum_h w2[c,h]*h[h] + b2[c])
            y = jnp.sum(w2_ref[...] * h, axis=1, keepdims=True) + b2_ref[...]
            gate_ref[0] = jax.nn.sigmoid(y).astype(gate_ref.dtype)   # (C, 1)

    gate = pl.pallas_call(
        pool_gate_kernel,
        out_shape=jax.ShapeDtypeStruct((N, C, 1), dtype),
        grid_spec=pltpu.PrefetchScalarGridSpec(
            num_scalar_prefetch=0,
            grid=(N, num_tiles),
            in_specs=[
                pl.BlockSpec((1, C, hw_tile), lambda b, t: (b, 0, t)),   # x tile
                pl.BlockSpec((C, hidden), lambda b, t: (0, 0)),          # W1^T
                pl.BlockSpec((1, hidden), lambda b, t: (0, 0)),          # b1
                pl.BlockSpec((C, hidden), lambda b, t: (0, 0)),          # W2
                pl.BlockSpec((C, 1), lambda b, t: (0, 0)),               # b2
            ],
            out_specs=pl.BlockSpec((1, C, 1), lambda b, t: (b, 0, 0)),
            scratch_shapes=[pltpu.VMEM((C, 1), jnp.float32)],
        ),
        compiler_params=pltpu.CompilerParams(
            dimension_semantics=("parallel", "arbitrary"),
            vmem_limit_bytes=vmem_limit),
    )(x, w1_t, b1_r, w2_r, b2_r)

    # ---------------- Pass 2: lane-dense elementwise scale --------------------
    # TODO(synk): if profiling shows exposed DMA, add pipeline_mode=pl.Buffered(3)
    # on the x BlockSpec (kept at the default here for maximum portability).
    out = pl.pallas_call(
        _scale_kernel,
        out_shape=jax.ShapeDtypeStruct((N, C, HW), dtype),
        grid_spec=pltpu.PrefetchScalarGridSpec(
            num_scalar_prefetch=0,
            grid=(N, num_tiles),
            in_specs=[
                pl.BlockSpec((1, C, 1), lambda b, t: (b, 0, 0)),         # gate
                pl.BlockSpec((1, C, hw_tile), lambda b, t: (b, 0, t)),   # x tile
            ],
            out_specs=pl.BlockSpec((1, C, hw_tile), lambda b, t: (b, 0, t)),
        ),
        compiler_params=pltpu.CompilerParams(
            dimension_semantics=("parallel", "parallel"),
            vmem_limit_bytes=vmem_limit),
    )(gate, x)

    return out.reshape(N, C, H, W)


def _reference(x, w1, b1, w2, b2):
    # pure-JAX reference of the PyTorch Local.forward (NCHW)
    pooled = jnp.mean(x, axis=(2, 3), keepdims=True)                       # (N, C, 1, 1)
    h = jnp.einsum('nchw,oc->nohw', pooled, w1) + b1[None, :, None, None]  # (N, hid, 1, 1)
    h = jnp.maximum(h, 0.0)
    y = jnp.einsum('nchw,oc->nohw', h, w2) + b2[None, :, None, None]       # (N, C, 1, 1)
    y = jax.nn.sigmoid(y)
    return x * y


if __name__ == "__main__":
    # module config: dim=4, growth_rate=2.0 -> hidden_dim=2
    dim, growth_rate = 4, 2.0
    hidden = int(dim // growth_rate)
    N, H, W = 2, 16, 16

    key = jax.random.PRNGKey(0)
    kx, k1, k2, k3, k4 = jax.random.split(key, 5)

    x = jax.random.normal(kx, (N, dim, H, W), dtype=jnp.float32)
    # Conv2d(dim, hidden, 1): weight (hidden, dim, 1, 1) -> squeeze to (hidden, dim)
    w1 = 0.2 * jax.random.normal(k1, (hidden, dim), dtype=jnp.float32)
    b1 = 0.1 * jax.random.normal(k2, (hidden,), dtype=jnp.float32)
    # Conv2d(hidden, dim, 1): weight (dim, hidden, 1, 1) -> (dim, hidden)
    w2 = 0.2 * jax.random.normal(k3, (dim, hidden), dtype=jnp.float32)
    b2 = 0.1 * jax.random.normal(k4, (dim,), dtype=jnp.float32)

    out = jax.block_until_ready(local_forward(x, w1, b1, w2, b2))
    ref = jax.block_until_ready(_reference(x, w1, b1, w2, b2))

    assert out.shape == x.shape and out.dtype == x.dtype
    assert jnp.allclose(out, ref, atol=1e-5, rtol=1e-5)
    print("KERNEL_OK")
</pallas_src>

<mosaic_0001>
module attributes {stable_mosaic.version = 11 : i64} {
  func.func @pool_gate_kernel(%arg0: i32, %arg1: i32, %arg2: memref<1x4x256xf32, #tpu.memory_space<vmem>>, %arg3: memref<4x2xf32, #tpu.memory_space<vmem>>, %arg4: memref<1x2xf32, #tpu.memory_space<vmem>>, %arg5: memref<4x2xf32, #tpu.memory_space<vmem>>, %arg6: memref<4x1xf32, #tpu.memory_space<vmem>>, %arg7: memref<1x4x1xf32, #tpu.memory_space<vmem>>, %arg8: memref<4x1xf32, #tpu.memory_space<vmem>>) attributes {dimension_semantics = [#tpu.dimension_semantics<parallel>, #tpu.dimension_semantics<arbitrary>], iteration_bounds = array<i64: 2, 1>, scalar_prefetch = 0 : i64, scratch_operands = 1 : i64, tpu.core_type = #tpu.core_type<tc>, window_params = [{transform_indices = @transform_0, window_bounds = array<i64: 1, 4, 256>}, {pipeline_mode = #tpu.pipeline_mode<synchronous>, transform_indices = @transform_1, window_bounds = array<i64: 4, 2>}, {pipeline_mode = #tpu.pipeline_mode<synchronous>, transform_indices = @transform_2, window_bounds = array<i64: 1, 2>}, {pipeline_mode = #tpu.pipeline_mode<synchronous>, transform_indices = @transform_3, window_bounds = array<i64: 4, 2>}, {pipeline_mode = #tpu.pipeline_mode<synchronous>, transform_indices = @transform_4, window_bounds = array<i64: 4, 1>}, {transform_indices = @transform_5, window_bounds = array<i64: 1, 4, 1>}]} {
    %c0_i32 = arith.constant 0 : i32
    %0 = arith.cmpi eq, %arg1, %c0_i32 : i32
    %1 = arith.extui %0 : i1 to i32
    %c0_i32_0 = arith.constant 0 : i32
    %2 = arith.cmpi ne, %1, %c0_i32_0 : i32
    scf.if %2 {
      %cst_9 = arith.constant 0.000000e+00 : f32
      %13 = vector.broadcast %cst_9 : f32 to vector<4x1xf32>
      %c0_10 = arith.constant 0 : index
      %c0_11 = arith.constant 0 : index
      %14 = vector.load %arg8[%c0_10, %c0_11] : memref<4x1xf32, #tpu.memory_space<vmem>>, vector<4x1xf32>
      tpu.vector_store %arg8[%c0_10, %c0_11], %13 {strides = array<i32>} : memref<4x1xf32, #tpu.memory_space<vmem>>, vector<4x1xf32>,
    } else {
    }
    %c0 = arith.constant 0 : index
    %c0_1 = arith.constant 0 : index
    %c0_2 = arith.constant 0 : index
    %3 = vector.load %arg2[%c0, %c0_1, %c0_2] : memref<1x4x256xf32, #tpu.memory_space<vmem>>, vector<1x4x256xf32>
    %4 = vector.shape_cast %3 : vector<1x4x256xf32> to vector<4x256xf32>
    %c0_3 = arith.constant 0 : index
    %c0_4 = arith.constant 0 : index
    %5 = vector.load %arg8[%c0_3, %c0_4] : memref<4x1xf32, #tpu.memory_space<vmem>>, vector<4x1xf32>
    %cst = arith.constant dense<0.000000e+00> : vector<4xf32>
    %6 = vector.multi_reduction <add>, %4, %cst [1] : vector<4x256xf32> to vector<4xf32>
    %7 = vector.shape_cast %6 : vector<4xf32> to vector<4x1xf32>
    %8 = arith.addf %5, %7 : vector<4x1xf32>
    %c0_5 = arith.constant 0 : index
    %c0_6 = arith.constant 0 : index
    %9 = vector.load %arg8[%c0_5, %c0_6] : memref<4x1xf32, #tpu.memory_space<vmem>>, vector<4x1xf32>
    tpu.vector_store %arg8[%c0_5, %c0_6], %8 {strides = array<i32>} : memref<4x1xf32, #tpu.memory_space<vmem>>, vector<4x1xf32>,
    %c0_i32_7 = arith.constant 0 : i32
    %10 = arith.cmpi eq, %arg1, %c0_i32_7 : i32
    %11 = arith.extui %10 : i1 to i32
    %c0_i32_8 = arith.constant 0 : i32
    %12 = arith.cmpi ne, %11, %c0_i32_8 : i32
    scf.if %12 {
      %c0_9 = arith.constant 0 : index
      %c0_10 = arith.constant 0 : index
      %13 = vector.load %arg8[%c0_9, %c0_10] : memref<4x1xf32, #tpu.memory_space<vmem>>, vector<4x1xf32>
      %cst_11 = arith.constant 2.560000e+02 : f32
      %14 = vector.broadcast %cst_11 : f32 to vector<4x1xf32>
      %15 = arith.divf %13, %14 : vector<4x1xf32>
      %c0_12 = arith.constant 0 : index
      %c0_13 = arith.constant 0 : index
      %16 = vector.load %arg3[%c0_12, %c0_13] : memref<4x2xf32, #tpu.memory_space<vmem>>, vector<4x2xf32>
      %17 = vector.broadcast %15 : vector<4x1xf32> to vector<4x2xf32>
      %18 = arith.mulf %16, %17 : vector<4x2xf32>
      %cst_14 = arith.constant dense<0.000000e+00> : vector<2xf32>
      %19 = vector.multi_reduction <add>, %18, %cst_14 [0] : vector<4x2xf32> to vector<2xf32>
      %20 = vector.shape_cast %19 : vector<2xf32> to vector<1x2xf32>
      %c0_15 = arith.constant 0 : index
      %c0_16 = arith.constant 0 : index
      %21 = vector.load %arg4[%c0_15, %c0_16] : memref<1x2xf32, #tpu.memory_space<vmem>>, vector<1x2xf32>
      %22 = arith.addf %20, %21 : vector<1x2xf32>
      %cst_17 = arith.constant 0.000000e+00 : f32
      %23 = vector.broadcast %cst_17 : f32 to vector<1x2xf32>
      %24 = arith.maximumf %22, %23 : vector<1x2xf32>
      %c0_18 = arith.constant 0 : index
      %c0_19 = arith.constant 0 : index
      %25 = vector.load %arg5[%c0_18, %c0_19] : memref<4x2xf32, #tpu.memory_space<vmem>>, vector<4x2xf32>
      %26 = vector.broadcast %24 : vector<1x2xf32> to vector<4x2xf32>
      %27 = arith.mulf %25, %26 : vector<4x2xf32>
      %cst_20 = arith.constant dense<0.000000e+00> : vector<4xf32>
      %28 = vector.multi_reduction <add>, %27, %cst_20 [1] : vector<4x2xf32> to vector<4xf32>
      %29 = vector.shape_cast %28 : vector<4xf32> to vector<4x1xf32>
      %c0_21 = arith.constant 0 : index
      %c0_22 = arith.constant 0 : index
      %30 = vector.load %arg6[%c0_21, %c0_22] : memref<4x1xf32, #tpu.memory_space<vmem>>, vector<4x1xf32>
      %31 = arith.addf %29, %30 : vector<4x1xf32>
      %32 = arith.negf %31 : vector<4x1xf32>
      %33 = math.exp %32 : vector<4x1xf32>
      %cst_23 = arith.constant 1.000000e+00 : f32
      %34 = vector.broadcast %cst_23 : f32 to vector<4x1xf32>
      %35 = arith.addf %34, %33 : vector<4x1xf32>
      %36 = arith.divf %34, %35 : vector<4x1xf32>
      %c0_24 = arith.constant 0 : index
      %c0_25 = arith.constant 0 : index
      %c0_26 = arith.constant 0 : index
      %37 = vector.load %arg7[%c0_24, %c0_25, %c0_26] : memref<1x4x1xf32, #tpu.memory_space<vmem>>, vector<1x4x1xf32>
      %38 = vector.shape_cast %37 : vector<1x4x1xf32> to vector<4x1xf32>
      %39 = vector.shape_cast %36 : vector<4x1xf32> to vector<1x4x1xf32>
      tpu.vector_store %arg7[%c0_24, %c0_25, %c0_26], %39 {strides = array<i32>} : memref<1x4x1xf32, #tpu.memory_space<vmem>>, vector<1x4x1xf32>,
    } else {
    }
    return
  }
  func.func @transform_0(%arg0: i32, %arg1: i32) -> (i32, i32, i32) {
    %c0_i32 = arith.constant 0 : i32
    %c0_i32_0 = arith.constant 0 : i32
    return %arg0, %c0_i32, %arg1 : i32, i32, i32
  }
  func.func @transform_1(%arg0: i32, %arg1: i32) -> (i32, i32) {
    %c0_i32 = arith.constant 0 : i32
    %c0_i32_0 = arith.constant 0 : i32
    %c0_i32_1 = arith.constant 0 : i32
    return %c0_i32, %c0_i32_0 : i32, i32
  }
  func.func @transform_2(%arg0: i32, %arg1: i32) -> (i32, i32) {
    %c0_i32 = arith.constant 0 : i32
    %c0_i32_0 = arith.constant 0 : i32
    %c0_i32_1 = arith.constant 0 : i32
    return %c0_i32, %c0_i32_0 : i32, i32
  }
  func.func @transform_3(%arg0: i32, %arg1: i32) -> (i32, i32) {
    %c0_i32 = arith.constant 0 : i32
    %c0_i32_0 = arith.constant 0 : i32
    %c0_i32_1 = arith.constant 0 : i32
    return %c0_i32, %c0_i32_0 : i32, i32
  }
  func.func @transform_4(%arg0: i32, %arg1: i32) -> (i32, i32) {
    %c0_i32 = arith.constant 0 : i32
    %c0_i32_0 = arith.constant 0 : i32
    %c0_i32_1 = arith.constant 0 : i32
    return %c0_i32, %c0_i32_0 : i32, i32
  }
  func.func @transform_5(%arg0: i32, %arg1: i32) -> (i32, i32, i32) {
    %c0_i32 = arith.constant 0 : i32
    %c0_i32_0 = arith.constant 0 : i32
    %c0_i32_1 = arith.constant 0 : i32
    return %arg0, %c0_i32, %c0_i32_0 : i32, i32, i32
  }
}

</mosaic_0001>

<bundles_post_ra>
// kernel: tpu_custom_call.1
= control target key start
LH: loop header
LB: loop body
LE: loop exit
PB: predicated region body
PF: predicated region fallthrough
CT: control target
= control target key end

     0   :  { %10 = vsyncpa [#allocation4], 0  ;;  %s714_s0 = inlined_call_operand.hbm [shape: f32[2,4,256], index: 0, kind: input, shape index: {}]   ;;  %s715_s1 = inlined_call_operand.vmem [shape: f32[4,2], index: 1, kind: input, shape index: {}]   ;;  %s716_s2 = inlined_call_operand.vmem [shape: f32[1,2], index: 2, kind: input, shape index: {}]   ;;  %s717_s3 = inlined_call_operand.vmem [shape: f32[4,2], index: 3, kind: input, shape index: {}]   ;;  %s718_s4 = inlined_call_operand.vmem [shape: f32[4,1], index: 4, kind: input, shape index: {}]   ;;  %s719_s5 = inlined_call_operand.vmem [shape: f32[2,4,1], index: 5, kind: output, shape index: {}]  }
   0x1   :  { %12 = vsyncpa [#allocation4 + $0x1], 0  ;;  %s611_s18 = smov 0   ;;  %s613_s19 = smov 0  }
   0x2   :  { %s615_s20 = smov 0   ;;  %s617_s21 = smov 0  }
   0x3   :  { %s619_s22 = smov 0   ;;  %s621_s23 = smov 0  }
   0x4 LB: > { %s417_s24 = sadd.s32 4294967295, %s576_s23   ;;  %s30_s25 = sadd.s32 1, %s572_s22  ;;  %s576_s23 = sphi %s621_s23, %s18_s23   ;;  %s572_s22 = sphi %s619_s22, %s726_s22   ;;  %s568_s21 = sphi %s617_s21, %s725_s21   ;;  %s564_s20 = sphi %s615_s20, %s724_s20   ;;  %s560_s19 = sphi %s613_s19, %s723_s19   ;;  %s556_s18 = sphi %s611_s18, %s722_s18  }
   0x5   : > { %p32_p0 = scmp.ge.s32.totalorder %s30_s25, 2  ;;  %s39_s26 = sadd.s32 1, %s564_s20 }
   0x6   : > { %p46_p1 = scmp.ne.s32.totalorder %s564_s20, %s560_s19  ;;  %p47_p2 = scmp.eq.s32.totalorder %s576_s23, 0 }
   0x7   : > { %s728_s25 = smov (%p32_p0, %s30_s25), 0  ;;  %p52_p4 = scmp.ne.s32.totalorder %s560_s19, %s556_s18 }
   0x8   : > { %p647_p3 = por %p47_p2, %p46_p1  ;;  %s34_s28 = ssub.s32 %s572_s22, %s728_s25 }
   0x9   : > { %p53_p5 = scmp.eq.s32.totalorder %s417_s24, 0  ;;  %p37_p6 = scmp.eq.s32.totalorder %s34_s28, 0 }
   0xa   : > { %p437_p8 = scmp.lt.s32.totalorder %s576_s23, 2  ;;  %s198_s6 = sand.u32 1, %s564_s20  }
   0xb   : > { %p654_p7 = por %p53_p5, %p52_p4  ;;  %s430_s7 = sshll.u32 %s572_s22, 3 }
   0xc   : > { %s660_s30 = scalar_select %p37_p6, %s564_s20, %s39_s26  }
   0xd   : > { %s421_s8 = sshll.u32 %s198_s6, 3  ;;  %s209_s11 = scalar_lea.hbm %s714_s0, %s430_s7 }
   0xe   : > { %s211_s12 = sshll.u32 %s209_s11, 4  ;;  %s202_s13 = scalar_lea.vmem [#allocation3], %s421_s8  ;;  %s212_s12 = int_to_ptr.hbm [resolvable:$true] %s211_s12 }
   0xf   : > { %s213_s14 = sshll.u32 %s202_s13, 4  ;;  %p434_p9 = pnand %p437_p8, %p647_p3  ;;  %s214_s14 = int_to_ptr.vmem [resolvable:$true] %s213_s14 }
  0x10   : > { %p424_p10 = scmp.ge.s32.totalorder %s576_s23, 1  ;;  %p218_p11 = scmp.lt.s32.totalorder %s576_s23, 3 }
  0x11   : > { %s199_s15 = scalar_lea.sflag [#allocation4], %s198_s6 }
  0x12   : > { %436 = dma.hbm_to_vmem [thread:$0]  (!%p434_p9), %s212_s12, 128, %s214_s14, %s199_s15  }
  0x13   : > { %p219_p12 = pnand %p424_p10, %p218_p11 }
  0x14   : > { %s224_s16 = sand.u32 (!%p219_p12), 1, %s560_s19  }
  0x15   : > { %222 = sbr.rel (%p219_p12) target bundleno = 454 (0x1c6), region = 40  ;;  %s425_s17 = sshll.u32 (!%p219_p12), %s224_s16, 3 }
  0x16   : > { %s225_s18 = scalar_lea.sflag (!%p219_p12), [#allocation4], %s224_s16  ;;  %s228_s24 = scalar_lea.vmem (!%p219_p12), [#allocation3], %s425_s17 }
  0x1a   : > { %551 = dma.done.wait (%p654_p7), %s225_s18, 128  }
  0x1b   : > { %553 = vsyncadd (%p654_p7), %s225_s18, 4294967168  ;;  %vm264_vm0 = vcmask 3072   ;;  %v578_v0 = vmov 0.0   ;;  %v266_v1 = vld [vmem:[%s228_s24] sm:$0xff]  ;;  %vm274_vm1 = vcmask 1043456   ;;  %v579_v7 = vmov 0  }
  0x1c   : > { %265 = vst.msk [vmem:[#allocation2] sm:$0xf] %vm264_vm0, %v578_v0  ;;  %489 = vset.pattern.permute.xlu0 %v579_v7  ;;  %v580_v8 = vmov 256.0   ;;  %v295_v20 = vld [vmem:[%s715_s1] sm:$0xf]  ;;  %vm302_vm3 = vcmask 11264  }
  0x1d   : > { %269 = vst [vmem:[#allocation1] ss:$2 sm:$0xff] %v266_v1  ;;  %490 = vrcp.f32 %v580_v8  ;;  %v310_v29 = vld [vmem:[%s716_s2] sm:$0x1]  ;;  %p256_p13 = scmp.lt.s32.totalorder %s568_s21, 1 }
  0x1e   : > { %v313_v33 = vld [vmem:[%s717_s3] sm:$0xf] }
  0x1f   : > { %v319_v37 = vld [vmem:[%s718_s4] sm:$0xf]  ;;  %s730_s21 = smov (!%p256_p13, %s568_s21), 1 }
  0x20   : > { %s426_s10 = sshll.u32 %s730_s21, 2 }
  0x21   : > { %s259_s13 = scalar_lea.vmem %s719_s5, %s426_s10 }
  0x23   : > { %v491_v9 = vpop.eup %490  ;;  %v267_v12 = vld [vmem:[#allocation2] sm:$0xf] }
  0x24   : > { %v270_v2 = vld.sshfl [vmem:[#allocation1] sm:$0xff pattern:$0x75316420]  ;;  %v271_v3 = vld.sshfl [vmem:[#allocation1 + $0x8] sm:$0xff pattern:$0x75316420]  ;;  %vm292_vm2 = vweird.f32 %v491_v9 }
  0x25   : > { %v275_v4 = vsel %vm274_vm1, %v270_v2, 0.0  ;;  %v276_v5 = vsel %vm274_vm1, %v271_v3, 0.0  ;;  %v288_v10 = vmul.f32 256.0, %v491_v9 }
  0x26   : > { %v277_v6 = vadd.f32 %v276_v5, %v275_v4 }
  0x27   : > { %v289_v11 = vsub.f32 1.0, %v288_v10 }
  0x28   : > { %278 = vadd.xlane.f32.xlu0 %v277_v6 }
  0x29   : > { %v290_v14 = vmul.f32 %v491_v9, %v289_v11 }
  0x2b   : > { %v291_v16 = vadd.f32 %v491_v9, %v290_v14 }
  0x2d   : > { %v293_v17 = vsel %vm292_vm2, %v491_v9, %v291_v16 }
  0x9b   : > { %v279_v13 = vpop.xlane.xlu0 %278 }
  0x9c   : > { %v280_v15 = vadd.f32 %v279_v13, %v267_v12 }
  0x9e   : > { %282 = vst.msk [vmem:[#allocation2] sm:$0xf] %vm264_vm0, %v280_v15 }
  0xa5   : > { %v286_v18 = vld [vmem:[#allocation2] sm:$0xf] }
  0xa6   : > { %v294_v19 = vmul.f32 %v293_v17, %v286_v18 }
  0xa8   : > { %298 = vperm.xlu0 %489, %v294_v19  }
 0x11a   : > { %v299_v21 = vpop.permute.xlu0 %298 }
 0x11b   : > { %v301_v22 = vmul.f32 %v299_v21, %v295_v20 }
 0x11d   : > { %v303_v23 = vsel %vm302_vm3, %v301_v22, 0.0 }
 0x11e   : > { %v304_v24 = vrot.slane %v303_v23, 4 }
 0x120   : > { %v305_v25 = vadd.f32 %v304_v24, %v303_v23 }
 0x122   : > { %v306_v26 = vrot.slane %v305_v25, 2 }
 0x124   : > { %v307_v27 = vadd.f32 %v306_v26, %v305_v25 }
 0x126   : > { %v308_v28 = vrot.slane %v307_v27, 1 }
 0x128   : > { %v309_v30 = vadd.f32 %v308_v28, %v307_v27 }
 0x12a   : > { %v311_v31 = vadd.f32 %v310_v29, %v309_v30 }
 0x12c   : > { %v312_v32 = vmax.f32 %v311_v31, 0.0 }
 0x12e   : > { %v314_v34 = vperm.slane %v312_v32, 0 }
 0x130   : > { %v315_v35 = vmul.f32 %v314_v34, %v313_v33 }
 0x132   : > { %v316_v36 = vsel %vm302_vm3, %v315_v35, 0.0 }
 0x133   : > { %317 = vadd.xlane.f32.xlu1 %v316_v36 }
 0x1a6   : > { %v318_v38 = vpop.xlane.xlu1 %317 }
 0x1a7   : > { %v320_v39 = vadd.f32 %v319_v37, %v318_v38 }
 0x1a9   : > { %v427_v40 = vmul.f32 -1.442695, %v320_v39 }
 0x1ab   : > { %492 = vpow2.f32 %v427_v40 }
 0x1b1   : > { %v493_v41 = vpop.eup %492 }
 0x1b2   : > { %v324_v42 = vadd.f32 1.0, %v493_v41 }
 0x1b4   : > { %494 = vrcp.f32 %v324_v42  ;;  %v336_v46 = vand.u32 2147483648, %v324_v42  ;;  %v334_v48 = vand.u32 2147483647, %v324_v42  ;;  %vm330_vm5 = vweird.f32 %v324_v42 }
 0x1b6   : > { %v337_v50 = vor.u32 1.1754944e-38, %v336_v46  ;;  %vm335_vm7 = vcmp.eq.f32.partialorder %v334_v48, 8.507059e+37 }
 0x1ba   : > { %v495_v43 = vpop.eup %494 }
 0x1bb   : > { %v326_v44 = vmul.f32 %v495_v43, %v324_v42  ;;  %vm331_vm4 = vweird.f32 %v495_v43 }
 0x1bc   : > { %vm332_vm6 = vmor %vm330_vm5, %vm331_vm4 }
 0x1bd   : > { %v327_v45 = vsub.f32 1.0, %v326_v44 }
 0x1bf   : > { %v328_v47 = vmul.f32 %v495_v43, %v327_v45 }
 0x1c1   : > { %v329_v49 = vadd.f32 %v495_v43, %v328_v47 }
 0x1c3   : > { %v333_v51 = vsel %vm332_vm6, %v495_v43, %v329_v49 }
 0x1c4   : > { %v338_v52 = vsel %vm335_vm7, %v337_v50, %v333_v51 }
 0x1c5   : > { %340 = vst.msk [vmem:[%s259_s13] sm:$0xf] %vm264_vm0, %v338_v52 }
 0x1c6 PF: > { %s18_s23 = sadd.s32 1, %s576_s23   ;;  %s722_s18 = smov %s560_s19 }
 0x1c7   : > { %p15_p0 = scmp.ge.s32.totalorder %s18_s23, 4   ;;  %s723_s19 = smov %s564_s20 }
 0x1c8   : > { %s724_s20 = smov %s660_s30  ;;  %s725_s21 = smov %s572_s22 }
 0x1c9   : > { %s726_s22 = smov %s728_s25  ;;  %17 = sbr.rel (!%p15_p0) target bundleno = 4 (0x4), region = 88 }
 0x1ce   :  { %360 = vsyncpa [#allocation4], 1 }
 0x1cf   :  { %362 = vsyncpa [#allocation4 + $0x1], 1 }

</bundles_post_ra>
